<compile_context>
chip_gen: v7x
topology: tpu7x:2x2x1
jax: 0.10.0
libtpu: 0.0.40
codegen_flags: <defaults>
</compile_context>

<pallas_src>
import jax
import jax.numpy as jnp
from jax.experimental import pallas as pl
from jax.experimental.pallas import tpu as pltpu


def _spatial_attention_kernel(w_ref, x_ref, o_ref):
    # w_ref: (1, C)    x_ref / o_ref: (BN, C, TILE_HW)
    w = w_ref[...].astype(x_ref.dtype)          # tiny (1, C) cast, hoisted
    bn = x_ref.shape[0]
    for b in range(bn):                         # static unroll, bn <= 8
        xb = x_ref[b]                           # (C, TILE_HW), native dtype
        # 1x1 conv, one out-channel == channel contraction -> MXU, f32 accum
        z = jnp.dot(w, xb, preferred_element_type=jnp.float32)   # (1, TILE_HW)
        z = jax.nn.sigmoid(z)                   # EUP transcendental, f32
        o_ref[b] = (xb * z.astype(xb.dtype)).astype(o_ref.dtype)


def _vmem_budget():
    """(per-block byte budget, scoped-VMEM limit), generation aware."""
    try:
        vmem_cap = pltpu.get_tpu_info().vmem_capacity_bytes
    except Exception:
        vmem_cap = 64 * 1024 * 1024             # conservative (v7x-sized)
    if vmem_cap >= 100 * 1024 * 1024:           # v5e / v6e: 128 MiB physical
        return 8 * 1024 * 1024, 80 * 1024 * 1024
    return 4 * 1024 * 1024, 44 * 1024 * 1024    # v7x: 64 MiB per TensorCore


def _choose_blocking(N, C, HW, itemsize, budget_bytes):
    """Pick (bn, tile_hw): batch-fold factor and lane-dense spatial tile."""
    bytes_per_lane = max(C, 1) * itemsize
    # Largest multiple-of-128 lane count that keeps one (C, tile) block under
    # budget (>=128 lanes even for huge C, since all of C must be co-resident).
    max_lanes = max(128, (budget_bytes // bytes_per_lane) // 128 * 128)

    if HW > max_lanes:
        # Large spatial extent: lane-dense spatial tiling, one batch per step.
        # Last spatial tile may be partial -> Pallas masks its writeback.
        return 1, max_lanes

    # Whole spatial extent fits a single block; fold batch to fill the budget.
    tile_hw = HW                                 # == full dim, always legal
    bn_budget = max(1, budget_bytes // max(bytes_per_lane * HW, 1))
    bn_cap = min(N, bn_budget, 8)
    if bn_cap >= N and N >= 2:
        bn_cap = max(1, N // 2)                  # keep >= 2 grid steps (v7x: 2 TCs)
    bn = 1
    for cand in range(bn_cap, 0, -1):            # largest divisor of N <= cap
        if N % cand == 0:
            bn = cand
            break

    if N == 1 and HW >= 256:
        # Single batch, single tile would give a 1-step grid: split spatial so
        # the pipeline (and v7x's second core) has something to overlap.
        tile_hw = max(128, pl.cdiv(pl.cdiv(HW, 2), 128) * 128)

    return bn, tile_hw


def spatial_attention_2d(x_nchw, weight):
    """x_nchw: (N, C, H, W); weight: (1, C, 1, 1) as in nn.Conv2d(C, 1, 1, bias=False)."""
    N, C, H, W = x_nchw.shape
    HW = H * W
    x = x_nchw.reshape(N, C, HW)                 # contiguous, free
    w = weight.reshape(1, C)                     # lane-major weight

    itemsize = jnp.dtype(x_nchw.dtype).itemsize
    budget, vmem_limit = _vmem_budget()
    bn, tile_hw = _choose_blocking(N, C, HW, itemsize, budget)
    grid = (N // bn, pl.cdiv(HW, tile_hw))       # ragged last spatial tile OK

    cost = pl.CostEstimate(
        flops=3 * N * C * HW,                    # dot (2) + broadcast mul (1)
        transcendentals=N * HW,                  # sigmoid
        bytes_accessed=2 * N * C * HW * itemsize + C * jnp.dtype(weight.dtype).itemsize,
    )

    out = pl.pallas_call(
        _spatial_attention_kernel,
        out_shape=jax.ShapeDtypeStruct((N, C, HW), x_nchw.dtype),
        grid_spec=pltpu.PrefetchScalarGridSpec(
            num_scalar_prefetch=0,
            grid=grid,
            in_specs=[
                # (1, C) weight: same block every step -> stays VMEM-resident
                pl.BlockSpec((1, C), lambda n, s: (0, 0)),
                # (bn, C, tile_hw) slab: bn batch elements x one spatial tile
                pl.BlockSpec((bn, C, tile_hw), lambda n, s: (n, 0, s)),
            ],
            out_specs=pl.BlockSpec((bn, C, tile_hw), lambda n, s: (n, 0, s)),
        ),
        compiler_params=pltpu.CompilerParams(
            dimension_semantics=("parallel", "parallel"),
            vmem_limit_bytes=vmem_limit,
        ),
        cost_estimate=cost,
    )(w, x)

    return out.reshape(N, C, H, W)


def _reference(x_nchw, weight):
    # pure-JAX reference of the PyTorch forward
    w = weight.reshape(1, -1, 1, 1)                       # (1, C, 1, 1)
    z = jnp.sum(x_nchw * w, axis=1, keepdims=True)        # (N, 1, H, W)
    z = jax.nn.sigmoid(z)
    return x_nchw * z


if __name__ == "__main__":
    key = jax.random.PRNGKey(0)
    kx, kw = jax.random.split(key)

    # Primary case (matches the module's expected small test shape).
    N, C, H, W = 2, 4, 16, 16
    x = jax.random.normal(kx, (N, C, H, W), dtype=jnp.float32)
    weight = jax.random.normal(kw, (1, C, 1, 1), dtype=jnp.float32) * 0.1

    out = spatial_attention_2d(x, weight)
    out = jax.block_until_ready(out)
    ref = _reference(x, weight)
    assert out.shape == (N, C, H, W)
    assert jnp.allclose(out, ref, atol=1e-5, rtol=1e-5), "mismatch vs reference"

    # Secondary case: odd spatial size (7x7, not a multiple of 128) and batch
    # folding (bn > 1) -- exercises the no-pad path.
    k2x, k2w = jax.random.split(jax.random.PRNGKey(1))
    N2, C2, H2, W2 = 4, 32, 7, 7
    x2 = jax.random.normal(k2x, (N2, C2, H2, W2), dtype=jnp.float32)
    w2 = jax.random.normal(k2w, (1, C2, 1, 1), dtype=jnp.float32) * 0.1
    out2 = jax.block_until_ready(spatial_attention_2d(x2, w2))
    assert jnp.allclose(out2, _reference(x2, w2), atol=1e-5, rtol=1e-5), "mismatch (odd HW)"

    print("KERNEL_OK")
</pallas_src>

<mosaic_0001>
module attributes {stable_mosaic.version = 11 : i64} {
  func.func @_spatial_attention_kernel(%arg0: i32, %arg1: i32, %arg2: memref<1x4xf32, #tpu.memory_space<vmem>>, %arg3: memref<1x4x256xf32, #tpu.memory_space<vmem>>, %arg4: memref<1x4x256xf32, #tpu.memory_space<vmem>>) attributes {dimension_semantics = [#tpu.dimension_semantics<parallel>, #tpu.dimension_semantics<parallel>], iteration_bounds = array<i64: 2, 1>, scalar_prefetch = 0 : i64, scratch_operands = 0 : i64, tpu.core_type = #tpu.core_type<tc>, window_params = [{pipeline_mode = #tpu.pipeline_mode<synchronous>, transform_indices = @transform_0, window_bounds = array<i64: 1, 4>}, {transform_indices = @transform_1, window_bounds = array<i64: 1, 4, 256>}, {transform_indices = @transform_2, window_bounds = array<i64: 1, 4, 256>}]} {
    %c0 = arith.constant 0 : index
    %c0_0 = arith.constant 0 : index
    %0 = vector.load %arg2[%c0, %c0_0] : memref<1x4xf32, #tpu.memory_space<vmem>>, vector<1x4xf32>
    %c0_1 = arith.constant 0 : index
    %c0_2 = arith.constant 0 : index
    %c0_3 = arith.constant 0 : index
    %1 = vector.load %arg3[%c0_1, %c0_2, %c0_3] : memref<1x4x256xf32, #tpu.memory_space<vmem>>, vector<1x4x256xf32>
    %2 = vector.shape_cast %1 : vector<1x4x256xf32> to vector<4x256xf32>
    %cst = arith.constant dense<0.000000e+00> : vector<1x256xf32>
    %3 = tpu.matmul %0, %2, %cst {dimension_numbers = #tpu.dot_dimension_numbers<[1], [0], [0], [1], [0, 0, 1, 1], [], []>} : vector<1x4xf32>, vector<4x256xf32>, vector<1x256xf32> -> vector<1x256xf32>
    %4 = arith.negf %3 : vector<1x256xf32>
    %5 = math.exp %4 : vector<1x256xf32>
    %cst_4 = arith.constant 1.000000e+00 : f32
    %6 = vector.broadcast %cst_4 : f32 to vector<1x256xf32>
    %7 = arith.addf %6, %5 : vector<1x256xf32>
    %8 = arith.divf %6, %7 : vector<1x256xf32>
    %9 = vector.broadcast %8 : vector<1x256xf32> to vector<4x256xf32>
    %10 = arith.mulf %2, %9 : vector<4x256xf32>
    %c0_5 = arith.constant 0 : index
    %c0_6 = arith.constant 0 : index
    %c0_7 = arith.constant 0 : index
    %11 = vector.load %arg4[%c0_5, %c0_6, %c0_7] : memref<1x4x256xf32, #tpu.memory_space<vmem>>, vector<1x4x256xf32>
    %12 = vector.shape_cast %11 : vector<1x4x256xf32> to vector<4x256xf32>
    %13 = vector.shape_cast %10 : vector<4x256xf32> to vector<1x4x256xf32>
    tpu.vector_store %arg4[%c0_5, %c0_6, %c0_7], %13 {strides = array<i32>} : memref<1x4x256xf32, #tpu.memory_space<vmem>>, vector<1x4x256xf32>,
    return
  }
  func.func @transform_0(%arg0: i32, %arg1: i32) -> (i32, i32) {
    %c0_i32 = arith.constant 0 : i32
    %c0_i32_0 = arith.constant 0 : i32
    %c0_i32_1 = arith.constant 0 : i32
    return %c0_i32, %c0_i32_0 : i32, i32
  }
  func.func @transform_1(%arg0: i32, %arg1: i32) -> (i32, i32, i32) {
    %c0_i32 = arith.constant 0 : i32
    %c0_i32_0 = arith.constant 0 : i32
    return %arg0, %c0_i32, %arg1 : i32, i32, i32
  }
  func.func @transform_2(%arg0: i32, %arg1: i32) -> (i32, i32, i32) {
    %c0_i32 = arith.constant 0 : i32
    %c0_i32_0 = arith.constant 0 : i32
    return %arg0, %c0_i32, %arg1 : i32, i32, i32
  }
}

</mosaic_0001>

<bundles_post_ra>
// kernel: tpu_custom_call.1
= control target key start
LH: loop header
LB: loop body
LE: loop exit
PB: predicated region body
PF: predicated region fallthrough
CT: control target
= control target key end

     0   :  { %7 = vsyncpa [#allocation3], 0  ;;  %s908_s0 = inlined_call_operand.hbm [shape: f32[1,4], index: 0, kind: input, shape index: {}]   ;;  %s909_s1 = inlined_call_operand.hbm [shape: f32[2,4,256], index: 1, kind: input, shape index: {}]   ;;  %s910_s2 = inlined_call_operand.hbm [shape: f32[2,4,256], index: 2, kind: output, shape index: {}]  }
   0x1   :  { %8 = vsyncpa [#allocation6], 0 }
   0x2   :  { %10 = vsyncpa [#allocation6 + $0x1], 0 }
   0x3   :  { %11 = vsyncpa [#allocation4], 0 }
   0x4   :  { %13 = vsyncpa [#allocation4 + $0x1], 0  ;;  %s688_s9 = smov 0   ;;  %s690_s10 = smov 0  }
   0x5   :  { %s692_s11 = smov 0   ;;  %s694_s12 = smov 0  }
   0x6   :  { %s696_s13 = smov 0   ;;  %s698_s14 = smov 0  }
   0x7 LB: > { %s416_s15 = sadd.s32 4294967295, %s667_s14   ;;  %s417_s16 = sadd.s32 4294967294, %s667_s14   ;;  %s667_s14 = sphi %s698_s14, %s19_s14   ;;  %s663_s13 = sphi %s696_s13, %s935_s13   ;;  %s659_s12 = sphi %s694_s12, %s934_s12   ;;  %s655_s11 = sphi %s692_s11, %s933_s11   ;;  %s651_s10 = sphi %s690_s10, %s932_s10   ;;  %s647_s9 = sphi %s688_s9, %s931_s9  }
   0x8   : > { %p74_p0 = scmp.ne.s32.totalorder %s651_s10, %s647_s9  ;;  %p722_p1 = scmp.eq.s32.totalorder %s416_s15, 0 }
   0x9   : > { %p726_p2 = scmp.eq.s32.totalorder %s416_s15, 1  ;;  %p106_p3 = scmp.eq.s32.totalorder %s417_s16, 1 }
   0xa   : > { %s915_s17 = scalar_select %p722_p1, 1, 0 }
   0xb   : > { %s916_s18 = scalar_select %p726_p2, 1, 0 }
   0xc   : > { %p732_p4 = por %p722_p1, %p74_p0  ;;  %p418_p5 = scmp.ge.s32.totalorder %s667_s14, 1 }
   0xd   : > { %p737_p6 = por %p106_p3, %p74_p0  ;;  %p113_p7 = scmp.lt.s32.totalorder %s667_s14, 3 }
   0xe   : > { %s917_s19 = scalar_select %p732_p4, 1, 0 }
   0xf   : > { %s918_s20 = scalar_select %p737_p6, 1, 0 }
  0x10   : > { %p742_p8 = pnand %p418_p5, %p113_p7  ;;  %s669_s22 = smov [#allocation2]  }
  0x11   : > { %s126_s23 = sshll.u32 %s669_s22, 4  ;;  %s31_s25 = sadd.s32 1, %s663_s13  ;;  %s127_s23 = int_to_ptr.vmem [resolvable:$true] %s126_s23 }
  0x12   : > { %s919_s21 = scalar_select %p742_p8, 1, 0 }
  0x13   : > { %p448_p10 = pneg %p742_p8  ;;  %s61_s26 = sadd.s32 1, %s655_s11 }
  0x14   : > { %p757_p12 = scmp.ge.s32.totalorder %s31_s25, 2  ;;  %s523_s30 = scalar_lea.hbm %s908_s0, 16 }
  0x15   : > { %p751_p11 = pnand %p448_p10, %p722_p1  ;;  %p524_p13 = scmp.ne.s32.totalorder %s908_s0, %s523_s30 }
  0x16   : > { %s921_s27 = scalar_select %p757_p12, 1, 0 }
  0x17   : > { %p525_p0 = pneg %p751_p11  ;;  %p530_p7 = scmp.lt.u32.totalorder %s523_s30, %s908_s0 }
  0x19   : > { %p526_p3 = pnand %p525_p0, %p524_p13 }
  0x1b   : > { %p527_p5 = pneg %p526_p3 }
  0x1d   : > { %p532_p10 = pnand %p530_p7, %p527_p5 }
  0x1f   : > { %535 = shalt.err (!%p532_p10)
}
  0x20   : > { %s536_s7 = scalar_lea.vmem %s127_s23, 16  ;;  %s543_s8 = scalar_lea.vmem %s127_s23, 32 }
  0x21   : > { %p537_p9 = scmp.ne.s32.totalorder %s127_s23, %s536_s7  ;;  %p544_p1 = scmp.lt.s32.totalorder %s127_s23, %s127_s23 }
  0x22   : > { %p545_p8 = scmp.lt.s32.totalorder %s543_s8, %s536_s7 }
  0x23   : > { %p539_p6 = pnand %p537_p9, %p525_p0 }
  0x24   : > { %p546_p2 = por %p545_p8, %p544_p1 }
  0x25   : > { %p540_p4 = pneg %p539_p6 }
  0x27   : > { %p547_p12 = pnand %p546_p2, %p540_p4 }
  0x29   : > { %550 = shalt.err (!%p547_p12)
}
  0x2a   : > { %451 = dma.hbm_to_vmem [thread:$0]  (!%p751_p11), %s908_s0, 16, %s127_s23, [#allocation3]  }
  0x2b   : > { %p922_p1 = scmp.ne.s32.totalorder %s921_s27, 0  ;;  %p68_p2 = scmp.ne.s32.totalorder %s655_s11, %s651_s10 }
  0x2c   : > { %p69_p4 = scmp.eq.s32.totalorder %s667_s14, 0  ;;  %p461_p6 = scmp.lt.s32.totalorder %s667_s14, 2 }
  0x2d   : > { %s937_s25 = smov (%p922_p1, %s31_s25), 0  ;;  %p923_p12 = scmp.ne.s32.totalorder %s916_s18, 0 }
  0x2e   : > { %s56_s22 = ssub.s32 %s663_s13, %s937_s25  ;;  %p70_p9 = por %p69_p4, %p68_p2 }
  0x2f   : > { %p59_p8 = scmp.eq.s32.totalorder %s56_s22, 0  ;;  %p789_p13 = por %p923_p12, %p68_p2 }
  0x30   : > { %s137_s28 = sand.u32 1, %s655_s11   ;;  %s438_s27 = sshll.u32 %s663_s13, 7 }
  0x31   : > { %s797_s29 = scalar_select %p59_p8, %s655_s11, %s61_s26  }
  0x32   : > { %s421_s23 = sshll.u32 %s137_s28, 3  ;;  %s803_s4 = scalar_lea.hbm %s909_s1, %s438_s27 }
  0x33   : > { %s141_s18 = scalar_lea.vmem [#allocation5], %s421_s23  ;;  %p807_p11 = pnand %p461_p6, %p70_p9 }
  0x34   : > { %s151_s5 = sshll.u32 %s141_s18, 4  ;;  %s138_s26 = scalar_lea.sflag [#allocation6], %s137_s28  ;;  %s805_s5 = int_to_ptr.vmem [resolvable:$true] %s151_s5 }
  0x35   : > { %s551_s7 = scalar_lea.hbm %s803_s4, 128  ;;  %p553_p3 = pneg %p807_p11 }
  0x36   : > { %p552_p0 = scmp.ne.s32.totalorder %s803_s4, %s551_s7  ;;  %s556_s16 = scalar_lea.hbm %s909_s1, 256 }
  0x37   : > { %p557_p10 = scmp.lt.u32.totalorder %s803_s4, %s909_s1  ;;  %p558_p1 = scmp.lt.u32.totalorder %s556_s16, %s551_s7 }
  0x38   : > { %p554_p5 = pnand %p553_p3, %p552_p0  ;;  %p560_p4 = scmp.lt.u32.totalorder %s551_s7, %s803_s4 }
  0x39   : > { %p559_p2 = por %p558_p1, %p557_p10 }
  0x3a   : > { %p555_p7 = pneg %p554_p5 }
  0x3b   : > { %p561_p6 = por %p560_p4, %p559_p2 }
  0x3d   : > { %p562_p8 = pnand %p561_p6, %p555_p7 }
  0x3f   : > { %565 = shalt.err (!%p562_p8)
}
  0x40   : > { %s566_s28 = scalar_lea.vmem %s805_s5, 128  ;;  %s670_s27 = smov [#allocation5]  }
  0x41   : > { %p567_p9 = scmp.ne.s32.totalorder %s805_s5, %s566_s28  ;;  %s571_s30 = sshll.u32 %s670_s27, 4  ;;  %s572_s30 = int_to_ptr.vmem [resolvable:$false] %s571_s30 }
  0x42   : > { %s573_s3 = scalar_lea.vmem %s572_s30, 256  ;;  %p574_p5 = scmp.lt.s32.totalorder %s805_s5, %s572_s30 }
  0x43   : > { %p569_p12 = pnand %p567_p9, %p553_p3  ;;  %p575_p10 = scmp.lt.s32.totalorder %s573_s3, %s566_s28 }
  0x45   : > { %p570_p0 = pneg %p569_p12  ;;  %p576_p1 = por %p575_p10, %p574_p5 }
  0x47   : > { %p577_p2 = pnand %p576_p1, %p570_p0 }
  0x49   : > { %580 = shalt.err (!%p577_p2)
}
  0x4a   : > { %455 = dma.hbm_to_vmem [thread:$0]  (!%p807_p11), %s803_s4, 128, %s805_s5, %s138_s26  }
  0x4b   : > { %p926_p7 = scmp.ne.s32.totalorder %s919_s21, 0 }
  0x4c   : > { %p927_p3 = scmp.ne.s32.totalorder (!%p926_p7), %s915_s17, 0 }
  0x4d   : > { %160 = sbr.rel (%p926_p7) target bundleno = 353 (0x161), region = 28 }
  0x54   : > { %634 = dma.done.wait (%p927_p3), [#allocation3], 16  }
  0x55   : > { %636 = vsyncadd (%p927_p3), [#allocation3], 4294967280  ;;  %s843_s18 = sand.u32 1, %s651_s10   ;;  %p928_p11 = scmp.ne.s32.totalorder %s917_s19, 0 }
  0x56   : > { %s426_s6 = sshll.u32 %s843_s18, 3  ;;  %s167_s7 = scalar_lea.sflag [#allocation6], %s843_s18 }
  0x57   : > { %s170_s4 = scalar_lea.vmem [#allocation5], %s426_s6 }
  0x58   : > { %638 = dma.done.wait (%p928_p11), %s167_s7, 128  }
  0x59   : > { %640 = vsyncadd (%p928_p11), %s167_s7, 4294967168  ;;  %v671_v0 = vmov 0.0   ;;  %v194_v1 = vld [vmem:[%s170_s4] sm:$0xff]  ;;  %vm201_vm0 = vcmask 1043456   ;;  %v193_v3 = vld [vmem:[#allocation2] sm:$0x1]  ;;  %v289_v12 = vlaneseq }
  0x5a   : > { %270 = vmatprep.mubr.f32.mxu0 %v671_v0  ;;  %v196_v2 = vcombine.high %v194_v1, %v194_v1  ;;  %vm197_vm1 = vcmask 31744   ;;  %s439_s17 = sshll.u32 %s659_s12, 7  ;;  %s190_s19 = scalar_lea.vmem [#allocation7], %s426_s6 }
  0x5b   : > { %v290_v13 = vshrl.u32 %v289_v12, 7  ;;  %s320_s21 = sshll.u32 %s190_s19, 4  ;;  %s859_s8 = scalar_lea.hbm %s910_s2, %s439_s17  ;;  %s861_s21 = int_to_ptr.vmem [resolvable:$true] %s320_s21 }
  0x5c   : > { %428 = vmatprep.subr.msk.mxu0 %vm201_vm0, %v196_v2  ;;  %s304_s15 = scalar_lea.sflag [#allocation4], %s843_s18  ;;  %s581_s16 = scalar_lea.vmem %s861_s21, 128 }
  0x5d   : > { %429 = vmatpush1.msk.msra.mxu0 %vm201_vm0, %v194_v1  ;;  %v291_v14 = vsub.s32 0, %v290_v13  ;;  %p582_p4 = scmp.ne.s32.totalorder %s861_s21, %s581_s16  ;;  %s672_s12 = smov [#allocation7]  }
  0x5e   : > { %430 = vmatmul.mubr.msk.f32.vlgmr.msra.gmra.mrb[0].mxu0 %vm197_vm1, %v193_v3  ;;  %s585_s22 = sshll.u32 %s672_s12, 4  ;;  %s586_s22 = int_to_ptr.vmem [resolvable:$false] %s585_s22 }
  0x5f   : > { %p583_p6 = pnand %p582_p4, %p789_p13  ;;  %s587_s23 = scalar_lea.vmem %s586_s22, 256 }
  0x60   : > { %p588_p9 = scmp.lt.s32.totalorder %s861_s21, %s586_s22  ;;  %p589_p12 = scmp.lt.s32.totalorder %s587_s23, %s581_s16 }
  0x61   : > { %p584_p8 = pneg %p583_p6 }
  0x62   : > { %p590_p0 = por %p589_p12, %p588_p9 }
  0x64   : > { %p591_p5 = pnand %p590_p0, %p584_p8 }
 0x131   : > { %v272_v4 = vpop.f32.mrb[0].mxu0 }
 0x132   : > { %v431_v5 = vmul.f32 -1.442695, %v272_v4  ;;  %v274_v6 = vpop.f32.mrb[1].mxu0 }
 0x133   : > { %v432_v7 = vmul.f32 -1.442695, %v274_v6 }
 0x134   : > { %515 = vpow2.f32 %v431_v5 }
 0x135   : > { %517 = vpow2.f32 %v432_v7 }
 0x13e   : > { %v516_v8 = vpop.eup %515 }
 0x13f   : > { %v518_v9 = vpop.eup %517  ;;  %v283_v10 = vadd.f32 1.0, %v516_v8 }
 0x140   : > { %v284_v11 = vadd.f32 1.0, %v518_v9 }
 0x141   : > { %519 = vrcp.f32 %v283_v10 }
 0x142   : > { %521 = vrcp.f32 %v284_v11 }
 0x14b   : > { %v520_v15 = vpop.eup %519 }
 0x14c   : > { %v522_v16 = vpop.eup %521  ;;  %v292_v17 = vrot.slane %v520_v15, %v291_v14 }
 0x14d   : > { %v296_v18 = vrot.slane %v522_v16, %v291_v14 }
 0x14f   : > { %v299_v19 = vcombine.low %v292_v17, %v296_v18 }
 0x151   : > { %v301_v20 = vmul.f32 %v299_v19, %v194_v1 }
 0x153   : > { %302 = vst [vmem:[%s190_s19] sm:$0xff] %v301_v20 }
 0x154   : > { %594 = shalt.err (!%p591_p5)
}
 0x155   : > { %s595_s28 = scalar_lea.hbm %s859_s8, 128  ;;  %s599_s3 = scalar_lea.hbm %s910_s2, 256 }
 0x156   : > { %p596_p10 = scmp.ne.s32.totalorder %s859_s8, %s595_s28  ;;  %p600_p7 = scmp.lt.u32.totalorder %s859_s8, %s910_s2 }
 0x157   : > { %p601_p3 = scmp.lt.u32.totalorder %s599_s3, %s595_s28  ;;  %p603_p4 = scmp.lt.u32.totalorder %s595_s28, %s859_s8 }
 0x158   : > { %p597_p1 = pnand %p596_p10, %p789_p13 }
 0x159   : > { %p602_p11 = por %p601_p3, %p600_p7 }
 0x15a   : > { %p598_p2 = pneg %p597_p1 }
 0x15b   : > { %p604_p6 = por %p603_p4, %p602_p11 }
 0x15d   : > { %p605_p8 = pnand %p604_p6, %p598_p2 }
 0x15f   : > { %608 = shalt.err (!%p605_p8)
}
 0x160   : > { %446 = dma.vmem_to_hbm [thread:$0]  (%p789_p13), %s861_s21, 128, %s859_s8, %s304_s15  }
 0x161 PF: > { %s332_s7 = sand.u32 1, %s647_s9   ;;  %p929_p9 = scmp.ne.s32.totalorder %s918_s20, 0 }
 0x162   : > { %p930_p12 = scmp.ge.s32.totalorder %s667_s14, 2  ;;  %s333_s4 = scalar_lea.sflag [#allocation4], %s332_s7 }
 0x164   : > { %p457_p0 = pnand %p930_p12, %p929_p9 }
 0x166   : > { %642 = dma.done.wait (!%p457_p0), %s333_s4, 128  }
 0x167   : > { %644 = vsyncadd (!%p457_p0), %s333_s4, 4294967168  ;;  %s19_s14 = sadd.s32 1, %s667_s14   ;;  %s931_s9 = smov %s651_s10 }
 0x168   : > { %p16_p5 = scmp.ge.s32.totalorder %s19_s14, 4   ;;  %s932_s10 = smov %s655_s11 }
 0x169   : > { %s933_s11 = smov %s797_s29  ;;  %s934_s12 = smov %s663_s13 }
 0x16a   : > { %s935_s13 = smov %s937_s25  ;;  %18 = sbr.rel (!%p16_p5) target bundleno = 7 (0x7), region = 78 }
 0x171   :  { %338 = vsyncpa [#allocation3], 1 }
 0x172   :  { %340 = vsyncpa [#allocation3 + $0x1], 1 }
 0x173   :  { %341 = vsyncpa [#allocation6], 1 }
 0x174   :  { %343 = vsyncpa [#allocation6 + $0x1], 1 }
 0x175   :  { %344 = vsyncpa [#allocation4], 1 }
 0x176   :  { %346 = vsyncpa [#allocation4 + $0x1], 1 }

</bundles_post_ra>
